<compile_context>
chip_gen: v7x
topology: tpu7x:2x2x1
jax: 0.10.0
libtpu: 0.0.40
codegen_flags: <defaults>
</compile_context>

<pallas_src>
import functools

import jax
import jax.numpy as jnp
from jax.experimental import pallas as pl
from jax.experimental.pallas import tpu as pltpu

# ---- model hyper-parameters (small, consistent with the module) ----
BATCH = 4              # number of sentences processed per pallas_call
N_TOKENS = 8           # number of spaCy tokens per "sentence"
BERT_HIDDEN = 32       # bert hidden size (768 in the real model)
GCN_HIDDEN = 32        # gcn_hidden_dim (300 in the real model)
NUM_GCN_LAYERS = 4     # gcn_layers
NUM_CLASSES = 2        # num_classes

# lane / sublane padding for the output tile (lane-dense, unmasked stores)
LANE_PAD = 128
SUBLANE_PAD = 8


def bert_gcn_kernel(emb_ref, dep_ref, aff_ref,
                    fcw_ref, fcb_ref,
                    wa_ref, ba_ref, wd_ref, bd_ref,
                    cw_ref, cb_ref,
                    out_ref):
    """One sentence per grid step; weights stay VMEM-resident across steps."""
    f32 = jnp.float32

    emb = emb_ref[0]          # (N_TOKENS, BERT_HIDDEN)
    dep = dep_ref[0]          # (N_TOKENS, N_TOKENS)
    aff = aff_ref[0]          # (N_TOKENS, N_TOKENS)

    # fc: (N, Hb) @ (Hb, G) + (1, G)
    x = jnp.dot(emb, fcw_ref[...], preferred_element_type=f32) + fcb_ref[...]

    # 4 GCN layers, alternating dependency / affective adjacency.
    for i in range(NUM_GCN_LAYERS):
        adj = dep if i % 2 == 0 else aff
        a = jnp.dot(x, wa_ref[i], preferred_element_type=f32) + ba_ref[i]    # linear_a
        conv = jnp.dot(adj, a, preferred_element_type=f32)                   # adj @ features
        act = jnp.maximum(conv, 0.0)                                         # ReLU
        d = jnp.dot(act, wd_ref[i], preferred_element_type=f32) + bd_ref[i]  # linear_d
        x = jnp.maximum(d, 0.0)                                              # ReLU

    # Fused mean-pool + classifier:
    #   mean(x, 0) @ W_cls + b_cls == (1/N) * sum(x @ W_cls, 0) + b_cls
    # -> classifier matmul runs with M = N_TOKENS (no M=1 MXU tile); the row
    #    reduction and scale run on the VPU/XLU.
    y = jnp.dot(x, cw_ref[...], preferred_element_type=f32)                  # (N, LANE_PAD)
    logits = jnp.sum(y, axis=0, keepdims=True) * (1.0 / N_TOKENS) + cb_ref[...]  # (1, LANE_PAD)

    # Lane-dense, sublane-dense store: broadcast to the full (8, 128) tile.
    out_ref[...] = jnp.broadcast_to(logits[None], (1, SUBLANE_PAD, LANE_PAD))


@jax.jit
def bert_gcn_forward(emb, dep_adj, aff_adj, params):
    """Batched wrapper: grid over sentences, weights resident, padded output."""
    batch = emb.shape[0]

    # Pad classifier to 128 lanes (zeros) so the epilogue store is unmasked.
    cls_w_pad = jnp.zeros((GCN_HIDDEN, LANE_PAD), jnp.float32)
    cls_w_pad = cls_w_pad.at[:, :NUM_CLASSES].set(params["cls_w"])
    cls_b_pad = jnp.zeros((1, LANE_PAD), jnp.float32)
    cls_b_pad = cls_b_pad.at[:, :NUM_CLASSES].set(params["cls_b"])

    # --- block specs -------------------------------------------------------
    # Per-sentence tensors: indexed by the grid id b.
    emb_spec = pl.BlockSpec((1, N_TOKENS, BERT_HIDDEN), lambda b: (b, 0, 0))
    dep_spec = pl.BlockSpec((1, N_TOKENS, N_TOKENS), lambda b: (b, 0, 0))
    aff_spec = pl.BlockSpec((1, N_TOKENS, N_TOKENS), lambda b: (b, 0, 0))
    # Weights / biases: constant index_map -> fetched once, VMEM-resident.
    fcw_spec = pl.BlockSpec((BERT_HIDDEN, GCN_HIDDEN), lambda b: (0, 0))
    fcb_spec = pl.BlockSpec((1, GCN_HIDDEN), lambda b: (0, 0))
    wa_spec = pl.BlockSpec((NUM_GCN_LAYERS, GCN_HIDDEN, GCN_HIDDEN), lambda b: (0, 0, 0))
    ba_spec = pl.BlockSpec((NUM_GCN_LAYERS, 1, GCN_HIDDEN), lambda b: (0, 0, 0))
    wd_spec = pl.BlockSpec((NUM_GCN_LAYERS, GCN_HIDDEN, GCN_HIDDEN), lambda b: (0, 0, 0))
    bd_spec = pl.BlockSpec((NUM_GCN_LAYERS, 1, GCN_HIDDEN), lambda b: (0, 0, 0))
    cw_spec = pl.BlockSpec((GCN_HIDDEN, LANE_PAD), lambda b: (0, 0))
    cb_spec = pl.BlockSpec((1, LANE_PAD), lambda b: (0, 0))
    # Lane-dense output slab: (B, 8, 128); sliced to (B, NUM_CLASSES) below.
    out_spec = pl.BlockSpec((1, SUBLANE_PAD, LANE_PAD), lambda b: (b, 0, 0))

    # --- advisory cost estimate (static shapes) ----------------------------
    flops_per_sentence = (
        2 * N_TOKENS * BERT_HIDDEN * GCN_HIDDEN                                   # fc
        + NUM_GCN_LAYERS * (2 * N_TOKENS * GCN_HIDDEN * GCN_HIDDEN                # linear_a
                            + 2 * N_TOKENS * N_TOKENS * GCN_HIDDEN                # adj @ a
                            + 2 * N_TOKENS * GCN_HIDDEN * GCN_HIDDEN)             # linear_d
        + 2 * N_TOKENS * GCN_HIDDEN * LANE_PAD                                    # classifier
    )
    bytes_accessed = 4 * (
        batch * (N_TOKENS * BERT_HIDDEN + 2 * N_TOKENS * N_TOKENS)                # emb + adjs
        + BERT_HIDDEN * GCN_HIDDEN + GCN_HIDDEN                                   # fc
        + 2 * NUM_GCN_LAYERS * (GCN_HIDDEN * GCN_HIDDEN + GCN_HIDDEN)             # gcn weights
        + GCN_HIDDEN * LANE_PAD + LANE_PAD                                        # classifier
        + batch * SUBLANE_PAD * LANE_PAD                                          # output slab
    )
    cost = pl.CostEstimate(flops=batch * flops_per_sentence,
                           transcendentals=0,
                           bytes_accessed=bytes_accessed)

    out = pl.pallas_call(
        bert_gcn_kernel,
        out_shape=jax.ShapeDtypeStruct((batch, SUBLANE_PAD, LANE_PAD), jnp.float32),
        grid=(batch,),
        in_specs=[emb_spec, dep_spec, aff_spec,
                  fcw_spec, fcb_spec,
                  wa_spec, ba_spec, wd_spec, bd_spec,
                  cw_spec, cb_spec],
        out_specs=out_spec,
        compiler_params=pltpu.CompilerParams(dimension_semantics=("parallel",)),
        cost_estimate=cost,
    )(emb, dep_adj, aff_adj,
      params["fc_w"], params["fc_b"],
      params["wa"], params["ba"], params["wd"], params["bd"],
      cls_w_pad, cls_b_pad)

    # (B, 8, 128) slab -> (B, NUM_CLASSES) logits (matches torch per-sentence).
    return out[:, 0, :NUM_CLASSES]


def reference_forward_single(emb, dep_adj, aff_adj, p):
    """Plain-JAX reference mirroring the PyTorch forward semantics (one sentence)."""
    x = emb @ p["fc_w"] + p["fc_b"]
    for i in range(NUM_GCN_LAYERS):
        adj = dep_adj if i % 2 == 0 else aff_adj
        a = x @ p["wa"][i] + p["ba"][i]
        act = jnp.maximum(adj @ a, 0.0)
        x = jnp.maximum(act @ p["wd"][i] + p["bd"][i], 0.0)
    pooled = jnp.mean(x, axis=0)
    return pooled @ p["cls_w"] + p["cls_b"][0]


def make_params(key):
    ks = jax.random.split(key, 8)
    scale = 0.1
    return {
        "fc_w": scale * jax.random.normal(ks[0], (BERT_HIDDEN, GCN_HIDDEN), jnp.float32),
        "fc_b": scale * jax.random.normal(ks[1], (1, GCN_HIDDEN), jnp.float32),
        "wa": scale * jax.random.normal(ks[2], (NUM_GCN_LAYERS, GCN_HIDDEN, GCN_HIDDEN), jnp.float32),
        "ba": scale * jax.random.normal(ks[3], (NUM_GCN_LAYERS, 1, GCN_HIDDEN), jnp.float32),
        "wd": scale * jax.random.normal(ks[4], (NUM_GCN_LAYERS, GCN_HIDDEN, GCN_HIDDEN), jnp.float32),
        "bd": scale * jax.random.normal(ks[5], (NUM_GCN_LAYERS, 1, GCN_HIDDEN), jnp.float32),
        "cls_w": scale * jax.random.normal(ks[6], (GCN_HIDDEN, NUM_CLASSES), jnp.float32),
        "cls_b": scale * jax.random.normal(ks[7], (1, NUM_CLASSES), jnp.float32),
    }


def make_inputs(key, batch):
    """Synthetic per-sentence inputs mirroring the module's graph construction."""
    k_emb, k_dep, k_aff = jax.random.split(key, 3)

    # Synthetic aligned BERT embeddings (stand-in for BertModel + alignment).
    # TODO(synk): real BERT encoder / tokenizer / spaCy alignment run off-device.
    emb = jax.random.normal(k_emb, (batch, N_TOKENS, BERT_HIDDEN), jnp.float32)

    # Dependency adjacency: identity + symmetric head/child edges (0/1),
    # as in build_dependency_graph.
    heads = jax.random.randint(k_dep, (batch, N_TOKENS), 0, N_TOKENS)
    eye = jnp.eye(N_TOKENS, dtype=jnp.float32)
    rows = jnp.arange(N_TOKENS)
    edges = jnp.zeros((batch, N_TOKENS, N_TOKENS), jnp.float32)
    edges = edges.at[jnp.arange(batch)[:, None], rows[None, :], heads].set(1.0)
    dep_adj = jnp.clip(eye[None] + edges + jnp.swapaxes(edges, 1, 2), 0.0, 1.0)

    # Affective adjacency: |score_i - score_j| from synthetic sentic scores,
    # as in build_affective_graph.
    scores = jax.random.uniform(k_aff, (batch, N_TOKENS), jnp.float32, -1.0, 1.0)
    aff_adj = jnp.abs(scores[:, :, None] - scores[:, None, :])

    return emb, dep_adj, aff_adj


if __name__ == "__main__":
    key = jax.random.PRNGKey(0)
    k_params, k_inputs = jax.random.split(key)

    params = make_params(k_params)
    emb, dep_adj, aff_adj = make_inputs(k_inputs, BATCH)

    logits = bert_gcn_forward(emb, dep_adj, aff_adj, params)
    logits = jax.block_until_ready(logits)

    ref = jax.vmap(functools.partial(reference_forward_single, p=params))(
        emb, dep_adj, aff_adj)

    assert logits.shape == (BATCH, NUM_CLASSES), logits.shape
    assert jnp.allclose(logits, ref, atol=1e-3, rtol=1e-3), (logits, ref)

    print("KERNEL_OK")
</pallas_src>

<mosaic_0001>
module attributes {stable_mosaic.version = 11 : i64} {
  func.func @bert_gcn_kernel(%arg0: i32, %arg1: memref<1x8x32xf32, #tpu.memory_space<vmem>>, %arg2: memref<1x8x8xf32, #tpu.memory_space<vmem>>, %arg3: memref<1x8x8xf32, #tpu.memory_space<vmem>>, %arg4: memref<32x32xf32, #tpu.memory_space<vmem>>, %arg5: memref<1x32xf32, #tpu.memory_space<vmem>>, %arg6: memref<4x32x32xf32, #tpu.memory_space<vmem>>, %arg7: memref<4x1x32xf32, #tpu.memory_space<vmem>>, %arg8: memref<4x32x32xf32, #tpu.memory_space<vmem>>, %arg9: memref<4x1x32xf32, #tpu.memory_space<vmem>>, %arg10: memref<32x128xf32, #tpu.memory_space<vmem>>, %arg11: memref<1x128xf32, #tpu.memory_space<vmem>>, %arg12: memref<1x8x128xf32, #tpu.memory_space<vmem>>) attributes {dimension_semantics = [#tpu.dimension_semantics<parallel>], iteration_bounds = array<i64: 4>, scalar_prefetch = 0 : i64, scratch_operands = 0 : i64, tpu.core_type = #tpu.core_type<tc>, window_params = [{transform_indices = @transform_0, window_bounds = array<i64: 1, 8, 32>}, {transform_indices = @transform_1, window_bounds = array<i64: 1, 8, 8>}, {transform_indices = @transform_2, window_bounds = array<i64: 1, 8, 8>}, {pipeline_mode = #tpu.pipeline_mode<synchronous>, transform_indices = @transform_3, window_bounds = array<i64: 32, 32>}, {pipeline_mode = #tpu.pipeline_mode<synchronous>, transform_indices = @transform_4, window_bounds = array<i64: 1, 32>}, {pipeline_mode = #tpu.pipeline_mode<synchronous>, transform_indices = @transform_5, window_bounds = array<i64: 4, 32, 32>}, {pipeline_mode = #tpu.pipeline_mode<synchronous>, transform_indices = @transform_6, window_bounds = array<i64: 4, 1, 32>}, {pipeline_mode = #tpu.pipeline_mode<synchronous>, transform_indices = @transform_7, window_bounds = array<i64: 4, 32, 32>}, {pipeline_mode = #tpu.pipeline_mode<synchronous>, transform_indices = @transform_8, window_bounds = array<i64: 4, 1, 32>}, {pipeline_mode = #tpu.pipeline_mode<synchronous>, transform_indices = @transform_9, window_bounds = array<i64: 32, 128>}, {pipeline_mode = #tpu.pipeline_mode<synchronous>, transform_indices = @transform_10, window_bounds = array<i64: 1, 128>}, {transform_indices = @transform_11, window_bounds = array<i64: 1, 8, 128>}]} {
    %c0 = arith.constant 0 : index
    %c0_0 = arith.constant 0 : index
    %c0_1 = arith.constant 0 : index
    %0 = vector.load %arg1[%c0, %c0_0, %c0_1] : memref<1x8x32xf32, #tpu.memory_space<vmem>>, vector<1x8x32xf32>
    %1 = vector.shape_cast %0 : vector<1x8x32xf32> to vector<8x32xf32>
    %c0_2 = arith.constant 0 : index
    %c0_3 = arith.constant 0 : index
    %c0_4 = arith.constant 0 : index
    %2 = vector.load %arg2[%c0_2, %c0_3, %c0_4] : memref<1x8x8xf32, #tpu.memory_space<vmem>>, vector<1x8x8xf32>
    %3 = vector.shape_cast %2 : vector<1x8x8xf32> to vector<8x8xf32>
    %c0_5 = arith.constant 0 : index
    %c0_6 = arith.constant 0 : index
    %c0_7 = arith.constant 0 : index
    %4 = vector.load %arg3[%c0_5, %c0_6, %c0_7] : memref<1x8x8xf32, #tpu.memory_space<vmem>>, vector<1x8x8xf32>
    %5 = vector.shape_cast %4 : vector<1x8x8xf32> to vector<8x8xf32>
    %c0_8 = arith.constant 0 : index
    %c0_9 = arith.constant 0 : index
    %6 = vector.load %arg4[%c0_8, %c0_9] : memref<32x32xf32, #tpu.memory_space<vmem>>, vector<32x32xf32>
    %cst = arith.constant dense<0.000000e+00> : vector<8x32xf32>
    %7 = tpu.matmul %1, %6, %cst {dimension_numbers = #tpu.dot_dimension_numbers<[1], [0], [0], [1], [0, 0, 1, 1], [], []>} : vector<8x32xf32>, vector<32x32xf32>, vector<8x32xf32> -> vector<8x32xf32>
    %c0_10 = arith.constant 0 : index
    %c0_11 = arith.constant 0 : index
    %8 = vector.load %arg5[%c0_10, %c0_11] : memref<1x32xf32, #tpu.memory_space<vmem>>, vector<1x32xf32>
    %9 = vector.broadcast %8 : vector<1x32xf32> to vector<8x32xf32>
    %10 = arith.addf %7, %9 : vector<8x32xf32>
    %c0_12 = arith.constant 0 : index
    %c0_13 = arith.constant 0 : index
    %c0_14 = arith.constant 0 : index
    %11 = vector.load %arg6[%c0_12, %c0_13, %c0_14] : memref<4x32x32xf32, #tpu.memory_space<vmem>>, vector<1x32x32xf32>
    %12 = vector.shape_cast %11 : vector<1x32x32xf32> to vector<32x32xf32>
    %cst_15 = arith.constant dense<0.000000e+00> : vector<8x32xf32>
    %13 = tpu.matmul %10, %12, %cst_15 {dimension_numbers = #tpu.dot_dimension_numbers<[1], [0], [0], [1], [0, 0, 1, 1], [], []>} : vector<8x32xf32>, vector<32x32xf32>, vector<8x32xf32> -> vector<8x32xf32>
    %c0_16 = arith.constant 0 : index
    %c0_17 = arith.constant 0 : index
    %c0_18 = arith.constant 0 : index
    %14 = vector.load %arg7[%c0_16, %c0_17, %c0_18] : memref<4x1x32xf32, #tpu.memory_space<vmem>>, vector<1x1x32xf32>
    %15 = vector.shape_cast %14 : vector<1x1x32xf32> to vector<1x32xf32>
    %16 = vector.broadcast %15 : vector<1x32xf32> to vector<8x32xf32>
    %17 = arith.addf %13, %16 : vector<8x32xf32>
    %cst_19 = arith.constant dense<0.000000e+00> : vector<8x32xf32>
    %18 = tpu.matmul %3, %17, %cst_19 {dimension_numbers = #tpu.dot_dimension_numbers<[1], [0], [0], [1], [0, 0, 1, 1], [], []>} : vector<8x8xf32>, vector<8x32xf32>, vector<8x32xf32> -> vector<8x32xf32>
    %cst_20 = arith.constant 0.000000e+00 : f32
    %19 = vector.broadcast %cst_20 : f32 to vector<8x32xf32>
    %20 = arith.maximumf %18, %19 : vector<8x32xf32>
    %c0_21 = arith.constant 0 : index
    %c0_22 = arith.constant 0 : index
    %c0_23 = arith.constant 0 : index
    %21 = vector.load %arg8[%c0_21, %c0_22, %c0_23] : memref<4x32x32xf32, #tpu.memory_space<vmem>>, vector<1x32x32xf32>
    %22 = vector.shape_cast %21 : vector<1x32x32xf32> to vector<32x32xf32>
    %cst_24 = arith.constant dense<0.000000e+00> : vector<8x32xf32>
    %23 = tpu.matmul %20, %22, %cst_24 {dimension_numbers = #tpu.dot_dimension_numbers<[1], [0], [0], [1], [0, 0, 1, 1], [], []>} : vector<8x32xf32>, vector<32x32xf32>, vector<8x32xf32> -> vector<8x32xf32>
    %c0_25 = arith.constant 0 : index
    %c0_26 = arith.constant 0 : index
    %c0_27 = arith.constant 0 : index
    %24 = vector.load %arg9[%c0_25, %c0_26, %c0_27] : memref<4x1x32xf32, #tpu.memory_space<vmem>>, vector<1x1x32xf32>
    %25 = vector.shape_cast %24 : vector<1x1x32xf32> to vector<1x32xf32>
    %26 = vector.broadcast %25 : vector<1x32xf32> to vector<8x32xf32>
    %27 = arith.addf %23, %26 : vector<8x32xf32>
    %cst_28 = arith.constant 0.000000e+00 : f32
    %28 = vector.broadcast %cst_28 : f32 to vector<8x32xf32>
    %29 = arith.maximumf %27, %28 : vector<8x32xf32>
    %c1 = arith.constant 1 : index
    %c0_29 = arith.constant 0 : index
    %c0_30 = arith.constant 0 : index
    %30 = vector.load %arg6[%c1, %c0_29, %c0_30] : memref<4x32x32xf32, #tpu.memory_space<vmem>>, vector<1x32x32xf32>
    %31 = vector.shape_cast %30 : vector<1x32x32xf32> to vector<32x32xf32>
    %cst_31 = arith.constant dense<0.000000e+00> : vector<8x32xf32>
    %32 = tpu.matmul %29, %31, %cst_31 {dimension_numbers = #tpu.dot_dimension_numbers<[1], [0], [0], [1], [0, 0, 1, 1], [], []>} : vector<8x32xf32>, vector<32x32xf32>, vector<8x32xf32> -> vector<8x32xf32>
    %c1_32 = arith.constant 1 : index
    %c0_33 = arith.constant 0 : index
    %c0_34 = arith.constant 0 : index
    %33 = vector.load %arg7[%c1_32, %c0_33, %c0_34] : memref<4x1x32xf32, #tpu.memory_space<vmem>>, vector<1x1x32xf32>
    %34 = vector.shape_cast %33 : vector<1x1x32xf32> to vector<1x32xf32>
    %35 = vector.broadcast %34 : vector<1x32xf32> to vector<8x32xf32>
    %36 = arith.addf %32, %35 : vector<8x32xf32>
    %cst_35 = arith.constant dense<0.000000e+00> : vector<8x32xf32>
    %37 = tpu.matmul %5, %36, %cst_35 {dimension_numbers = #tpu.dot_dimension_numbers<[1], [0], [0], [1], [0, 0, 1, 1], [], []>} : vector<8x8xf32>, vector<8x32xf32>, vector<8x32xf32> -> vector<8x32xf32>
    %cst_36 = arith.constant 0.000000e+00 : f32
    %38 = vector.broadcast %cst_36 : f32 to vector<8x32xf32>
    %39 = arith.maximumf %37, %38 : vector<8x32xf32>
    %c1_37 = arith.constant 1 : index
    %c0_38 = arith.constant 0 : index
    %c0_39 = arith.constant 0 : index
    %40 = vector.load %arg8[%c1_37, %c0_38, %c0_39] : memref<4x32x32xf32, #tpu.memory_space<vmem>>, vector<1x32x32xf32>
    %41 = vector.shape_cast %40 : vector<1x32x32xf32> to vector<32x32xf32>
    %cst_40 = arith.constant dense<0.000000e+00> : vector<8x32xf32>
    %42 = tpu.matmul %39, %41, %cst_40 {dimension_numbers = #tpu.dot_dimension_numbers<[1], [0], [0], [1], [0, 0, 1, 1], [], []>} : vector<8x32xf32>, vector<32x32xf32>, vector<8x32xf32> -> vector<8x32xf32>
    %c1_41 = arith.constant 1 : index
    %c0_42 = arith.constant 0 : index
    %c0_43 = arith.constant 0 : index
    %43 = vector.load %arg9[%c1_41, %c0_42, %c0_43] : memref<4x1x32xf32, #tpu.memory_space<vmem>>, vector<1x1x32xf32>
    %44 = vector.shape_cast %43 : vector<1x1x32xf32> to vector<1x32xf32>
    %45 = vector.broadcast %44 : vector<1x32xf32> to vector<8x32xf32>
    %46 = arith.addf %42, %45 : vector<8x32xf32>
    %cst_44 = arith.constant 0.000000e+00 : f32
    %47 = vector.broadcast %cst_44 : f32 to vector<8x32xf32>
    %48 = arith.maximumf %46, %47 : vector<8x32xf32>
    %c2 = arith.constant 2 : index
    %c0_45 = arith.constant 0 : index
    %c0_46 = arith.constant 0 : index
    %49 = vector.load %arg6[%c2, %c0_45, %c0_46] : memref<4x32x32xf32, #tpu.memory_space<vmem>>, vector<1x32x32xf32>
    %50 = vector.shape_cast %49 : vector<1x32x32xf32> to vector<32x32xf32>
    %cst_47 = arith.constant dense<0.000000e+00> : vector<8x32xf32>
    %51 = tpu.matmul %48, %50, %cst_47 {dimension_numbers = #tpu.dot_dimension_numbers<[1], [0], [0], [1], [0, 0, 1, 1], [], []>} : vector<8x32xf32>, vector<32x32xf32>, vector<8x32xf32> -> vector<8x32xf32>
    %c2_48 = arith.constant 2 : index
    %c0_49 = arith.constant 0 : index
    %c0_50 = arith.constant 0 : index
    %52 = vector.load %arg7[%c2_48, %c0_49, %c0_50] : memref<4x1x32xf32, #tpu.memory_space<vmem>>, vector<1x1x32xf32>
    %53 = vector.shape_cast %52 : vector<1x1x32xf32> to vector<1x32xf32>
    %54 = vector.broadcast %53 : vector<1x32xf32> to vector<8x32xf32>
    %55 = arith.addf %51, %54 : vector<8x32xf32>
    %cst_51 = arith.constant dense<0.000000e+00> : vector<8x32xf32>
    %56 = tpu.matmul %3, %55, %cst_51 {dimension_numbers = #tpu.dot_dimension_numbers<[1], [0], [0], [1], [0, 0, 1, 1], [], []>} : vector<8x8xf32>, vector<8x32xf32>, vector<8x32xf32> -> vector<8x32xf32>
    %cst_52 = arith.constant 0.000000e+00 : f32
    %57 = vector.broadcast %cst_52 : f32 to vector<8x32xf32>
    %58 = arith.maximumf %56, %57 : vector<8x32xf32>
    %c2_53 = arith.constant 2 : index
    %c0_54 = arith.constant 0 : index
    %c0_55 = arith.constant 0 : index
    %59 = vector.load %arg8[%c2_53, %c0_54, %c0_55] : memref<4x32x32xf32, #tpu.memory_space<vmem>>, vector<1x32x32xf32>
    %60 = vector.shape_cast %59 : vector<1x32x32xf32> to vector<32x32xf32>
    %cst_56 = arith.constant dense<0.000000e+00> : vector<8x32xf32>
    %61 = tpu.matmul %58, %60, %cst_56 {dimension_numbers = #tpu.dot_dimension_numbers<[1], [0], [0], [1], [0, 0, 1, 1], [], []>} : vector<8x32xf32>, vector<32x32xf32>, vector<8x32xf32> -> vector<8x32xf32>
    %c2_57 = arith.constant 2 : index
    %c0_58 = arith.constant 0 : index
    %c0_59 = arith.constant 0 : index
    %62 = vector.load %arg9[%c2_57, %c0_58, %c0_59] : memref<4x1x32xf32, #tpu.memory_space<vmem>>, vector<1x1x32xf32>
    %63 = vector.shape_cast %62 : vector<1x1x32xf32> to vector<1x32xf32>
    %64 = vector.broadcast %63 : vector<1x32xf32> to vector<8x32xf32>
    %65 = arith.addf %61, %64 : vector<8x32xf32>
    %cst_60 = arith.constant 0.000000e+00 : f32
    %66 = vector.broadcast %cst_60 : f32 to vector<8x32xf32>
    %67 = arith.maximumf %65, %66 : vector<8x32xf32>
    %c3 = arith.constant 3 : index
    %c0_61 = arith.constant 0 : index
    %c0_62 = arith.constant 0 : index
    %68 = vector.load %arg6[%c3, %c0_61, %c0_62] : memref<4x32x32xf32, #tpu.memory_space<vmem>>, vector<1x32x32xf32>
    %69 = vector.shape_cast %68 : vector<1x32x32xf32> to vector<32x32xf32>
    %cst_63 = arith.constant dense<0.000000e+00> : vector<8x32xf32>
    %70 = tpu.matmul %67, %69, %cst_63 {dimension_numbers = #tpu.dot_dimension_numbers<[1], [0], [0], [1], [0, 0, 1, 1], [], []>} : vector<8x32xf32>, vector<32x32xf32>, vector<8x32xf32> -> vector<8x32xf32>
    %c3_64 = arith.constant 3 : index
    %c0_65 = arith.constant 0 : index
    %c0_66 = arith.constant 0 : index
    %71 = vector.load %arg7[%c3_64, %c0_65, %c0_66] : memref<4x1x32xf32, #tpu.memory_space<vmem>>, vector<1x1x32xf32>
    %72 = vector.shape_cast %71 : vector<1x1x32xf32> to vector<1x32xf32>
    %73 = vector.broadcast %72 : vector<1x32xf32> to vector<8x32xf32>
    %74 = arith.addf %70, %73 : vector<8x32xf32>
    %cst_67 = arith.constant dense<0.000000e+00> : vector<8x32xf32>
    %75 = tpu.matmul %5, %74, %cst_67 {dimension_numbers = #tpu.dot_dimension_numbers<[1], [0], [0], [1], [0, 0, 1, 1], [], []>} : vector<8x8xf32>, vector<8x32xf32>, vector<8x32xf32> -> vector<8x32xf32>
    %cst_68 = arith.constant 0.000000e+00 : f32
    %76 = vector.broadcast %cst_68 : f32 to vector<8x32xf32>
    %77 = arith.maximumf %75, %76 : vector<8x32xf32>
    %c3_69 = arith.constant 3 : index
    %c0_70 = arith.constant 0 : index
    %c0_71 = arith.constant 0 : index
    %78 = vector.load %arg8[%c3_69, %c0_70, %c0_71] : memref<4x32x32xf32, #tpu.memory_space<vmem>>, vector<1x32x32xf32>
    %79 = vector.shape_cast %78 : vector<1x32x32xf32> to vector<32x32xf32>
    %cst_72 = arith.constant dense<0.000000e+00> : vector<8x32xf32>
    %80 = tpu.matmul %77, %79, %cst_72 {dimension_numbers = #tpu.dot_dimension_numbers<[1], [0], [0], [1], [0, 0, 1, 1], [], []>} : vector<8x32xf32>, vector<32x32xf32>, vector<8x32xf32> -> vector<8x32xf32>
    %c3_73 = arith.constant 3 : index
    %c0_74 = arith.constant 0 : index
    %c0_75 = arith.constant 0 : index
    %81 = vector.load %arg9[%c3_73, %c0_74, %c0_75] : memref<4x1x32xf32, #tpu.memory_space<vmem>>, vector<1x1x32xf32>
    %82 = vector.shape_cast %81 : vector<1x1x32xf32> to vector<1x32xf32>
    %83 = vector.broadcast %82 : vector<1x32xf32> to vector<8x32xf32>
    %84 = arith.addf %80, %83 : vector<8x32xf32>
    %cst_76 = arith.constant 0.000000e+00 : f32
    %85 = vector.broadcast %cst_76 : f32 to vector<8x32xf32>
    %86 = arith.maximumf %84, %85 : vector<8x32xf32>
    %c0_77 = arith.constant 0 : index
    %c0_78 = arith.constant 0 : index
    %87 = vector.load %arg10[%c0_77, %c0_78] : memref<32x128xf32, #tpu.memory_space<vmem>>, vector<32x128xf32>
    %cst_79 = arith.constant dense<0.000000e+00> : vector<8x128xf32>
    %88 = tpu.matmul %86, %87, %cst_79 {dimension_numbers = #tpu.dot_dimension_numbers<[1], [0], [0], [1], [0, 0, 1, 1], [], []>} : vector<8x32xf32>, vector<32x128xf32>, vector<8x128xf32> -> vector<8x128xf32>
    %cst_80 = arith.constant dense<0.000000e+00> : vector<128xf32>
    %89 = vector.multi_reduction <add>, %88, %cst_80 [0] : vector<8x128xf32> to vector<128xf32>
    %90 = vector.shape_cast %89 : vector<128xf32> to vector<1x128xf32>
    %cst_81 = arith.constant 1.250000e-01 : f32
    %91 = vector.broadcast %cst_81 : f32 to vector<1x128xf32>
    %92 = arith.mulf %90, %91 : vector<1x128xf32>
    %c0_82 = arith.constant 0 : index
    %c0_83 = arith.constant 0 : index
    %93 = vector.load %arg11[%c0_82, %c0_83] : memref<1x128xf32, #tpu.memory_space<vmem>>, vector<1x128xf32>
    %94 = arith.addf %92, %93 : vector<1x128xf32>
    %95 = vector.shape_cast %94 : vector<1x128xf32> to vector<1x1x128xf32>
    %96 = vector.shape_cast %95 : vector<1x1x128xf32> to vector<1x1x128xf32>
    %97 = vector.broadcast %96 : vector<1x1x128xf32> to vector<1x8x128xf32>
    %c0_84 = arith.constant 0 : index
    %c0_85 = arith.constant 0 : index
    %c0_86 = arith.constant 0 : index
    %98 = vector.load %arg12[%c0_84, %c0_85, %c0_86] : memref<1x8x128xf32, #tpu.memory_space<vmem>>, vector<1x8x128xf32>
    tpu.vector_store %arg12[%c0_84, %c0_85, %c0_86], %97 {strides = array<i32>} : memref<1x8x128xf32, #tpu.memory_space<vmem>>, vector<1x8x128xf32>,
    return
  }
  func.func @transform_0(%arg0: i32) -> (i32, i32, i32) {
    %c0_i32 = arith.constant 0 : i32
    %c0_i32_0 = arith.constant 0 : i32
    %c0_i32_1 = arith.constant 0 : i32
    return %arg0, %c0_i32, %c0_i32_0 : i32, i32, i32
  }
  func.func @transform_1(%arg0: i32) -> (i32, i32, i32) {
    %c0_i32 = arith.constant 0 : i32
    %c0_i32_0 = arith.constant 0 : i32
    %c0_i32_1 = arith.constant 0 : i32
    return %arg0, %c0_i32, %c0_i32_0 : i32, i32, i32
  }
  func.func @transform_2(%arg0: i32) -> (i32, i32, i32) {
    %c0_i32 = arith.constant 0 : i32
    %c0_i32_0 = arith.constant 0 : i32
    %c0_i32_1 = arith.constant 0 : i32
    return %arg0, %c0_i32, %c0_i32_0 : i32, i32, i32
  }
  func.func @transform_3(%arg0: i32) -> (i32, i32) {
    %c0_i32 = arith.constant 0 : i32
    %c0_i32_0 = arith.constant 0 : i32
    %c0_i32_1 = arith.constant 0 : i32
    return %c0_i32, %c0_i32_0 : i32, i32
  }
  func.func @transform_4(%arg0: i32) -> (i32, i32) {
    %c0_i32 = arith.constant 0 : i32
    %c0_i32_0 = arith.constant 0 : i32
    %c0_i32_1 = arith.constant 0 : i32
    return %c0_i32, %c0_i32_0 : i32, i32
  }
  func.func @transform_5(%arg0: i32) -> (i32, i32, i32) {
    %c0_i32 = arith.constant 0 : i32
    %c0_i32_0 = arith.constant 0 : i32
    %c0_i32_1 = arith.constant 0 : i32
    %c0_i32_2 = arith.constant 0 : i32
    return %c0_i32, %c0_i32_0, %c0_i32_1 : i32, i32, i32
  }
  func.func @transform_6(%arg0: i32) -> (i32, i32, i32) {
    %c0_i32 = arith.constant 0 : i32
    %c0_i32_0 = arith.constant 0 : i32
    %c0_i32_1 = arith.constant 0 : i32
    %c0_i32_2 = arith.constant 0 : i32
    return %c0_i32, %c0_i32_0, %c0_i32_1 : i32, i32, i32
  }
  func.func @transform_7(%arg0: i32) -> (i32, i32, i32) {
    %c0_i32 = arith.constant 0 : i32
    %c0_i32_0 = arith.constant 0 : i32
    %c0_i32_1 = arith.constant 0 : i32
    %c0_i32_2 = arith.constant 0 : i32
    return %c0_i32, %c0_i32_0, %c0_i32_1 : i32, i32, i32
  }
  func.func @transform_8(%arg0: i32) -> (i32, i32, i32) {
    %c0_i32 = arith.constant 0 : i32
    %c0_i32_0 = arith.constant 0 : i32
    %c0_i32_1 = arith.constant 0 : i32
    %c0_i32_2 = arith.constant 0 : i32
    return %c0_i32, %c0_i32_0, %c0_i32_1 : i32, i32, i32
  }
  func.func @transform_9(%arg0: i32) -> (i32, i32) {
    %c0_i32 = arith.constant 0 : i32
    %c0_i32_0 = arith.constant 0 : i32
    %c0_i32_1 = arith.constant 0 : i32
    return %c0_i32, %c0_i32_0 : i32, i32
  }
  func.func @transform_10(%arg0: i32) -> (i32, i32) {
    %c0_i32 = arith.constant 0 : i32
    %c0_i32_0 = arith.constant 0 : i32
    %c0_i32_1 = arith.constant 0 : i32
    return %c0_i32, %c0_i32_0 : i32, i32
  }
  func.func @transform_11(%arg0: i32) -> (i32, i32, i32) {
    %c0_i32 = arith.constant 0 : i32
    %c0_i32_0 = arith.constant 0 : i32
    %c0_i32_1 = arith.constant 0 : i32
    return %arg0, %c0_i32, %c0_i32_0 : i32, i32, i32
  }
}

</mosaic_0001>

<bundles_post_ra>
// kernel: bert_gcn_forward.1
= control target key start
LH: loop header
LB: loop body
LE: loop exit
PB: predicated region body
PF: predicated region fallthrough
CT: control target
= control target key end

     0   :  { %s2647_s0 = inlined_call_operand.vmem [shape: f32[4,8,32], index: 0, kind: input, shape index: {}]   ;;  %s2648_s1 = inlined_call_operand.vmem [shape: f32[4,8,8], index: 1, kind: input, shape index: {}]   ;;  %s2649_s2 = inlined_call_operand.hbm [shape: f32[4,8,8], index: 2, kind: input, shape index: {}]   ;;  %s2650_s3 = inlined_call_operand.hbm [shape: f32[32,32], index: 3, kind: input, shape index: {}]   ;;  %s2651_s4 = inlined_call_operand.vmem [shape: f32[1,32], index: 4, kind: input, shape index: {}]   ;;  %s2652_s5 = inlined_call_operand.vmem [shape: f32[4,32,32], index: 5, kind: input, shape index: {}]   ;;  %s2653_s6 = inlined_call_operand.vmem [shape: f32[4,1,32], index: 6, kind: input, shape index: {}]   ;;  %s2654_s7 = inlined_call_operand.hbm [shape: f32[4,32,32], index: 7, kind: input, shape index: {}]   ;;  %s2655_s8 = inlined_call_operand.vmem [shape: f32[4,1,32], index: 8, kind: input, shape index: {}]   ;;  %s2656_s9 = inlined_call_operand.vmem [shape: f32[32,128], index: 9, kind: input, shape index: {}]   ;;  %s2657_s10 = inlined_call_operand.vmem [shape: f32[1,128], index: 10, kind: input, shape index: {}]   ;;  %s2658_s11 = inlined_call_operand.vmem [shape: f32[4,8,128], index: 11, kind: output, shape index: {}]  }
   0x1   :  { %2662 = sst [smem:[#allocation9_spill]] %s2658_s11 }
   0x2   :  { %16 = vsyncpa [#allocation3], 0 }
   0x3   :  { %18 = vsyncpa [#allocation3 + $0x1], 0 }
   0x4   :  { %19 = vsyncpa [#allocation5], 0  ;;  %s2295_s17 = smov 0   ;;  %s2297_s18 = smov 0  }
   0x5   :  { %s2299_s19 = smov 0   ;;  %s2301_s20 = smov 0  }
   0x6 LB: > { %s2314_s21 = sadd.s32 4294967295, %s2225_s20   ;;  %p97_p0 = scmp.ne.s32.totalorder %s2217_s18, %s2213_s17  ;;  %s2225_s20 = sphi %s2301_s20, %s2675_s20   ;;  %s2221_s19 = sphi %s2299_s19, %s2674_s19   ;;  %s2217_s18 = sphi %s2297_s18, %s2673_s18   ;;  %s2213_s17 = sphi %s2295_s17, %s2672_s17  }
   0x7   : > { %p2659_p1 = scmp.eq.s32.totalorder %s2314_s21, 0  ;;  %p1732_p2 = scmp.ge.s32.totalorder %s2225_s20, 1 }
   0x8   : > { %p302_p3 = scmp.lt.s32.totalorder %s2225_s20, 5  ;;  %s2227_s24 = smov [#allocation4]  }
   0x9   : > { %p2322_p4 = por %p2659_p1, %p97_p0  ;;  %s314_s25 = sshll.u32 %s2227_s24, 4  ;;  %s315_s25 = int_to_ptr.vmem [resolvable:$true] %s314_s25 }
   0xa   : > { %p2326_p5 = pnand %p1732_p2, %p302_p3  ;;  %s2228_s27 = smov [#allocation6]  }
   0xb   : > { %s2663_s22 = scalar_select %p2322_p4, 1, 0 }
   0xc   : > { %s2664_s23 = scalar_select %p2326_p5, 1, 0 }
   0xd   : > { %p2046_p6 = pneg %p2326_p5  ;;  %s336_s28 = sshll.u32 %s2228_s27, 4  ;;  %s2338_s28 = int_to_ptr.vmem [resolvable:$true] %s336_s28 }
   0xe   : > { %s2101_s12 = scalar_lea.hbm %s2650_s3, 512 }
   0xf   : > { %p2334_p7 = pnand %p2046_p6, %p2659_p1  ;;  %p2102_p8 = scmp.ne.s32.totalorder %s2650_s3, %s2101_s12 }
  0x10   : > { %p2108_p12 = scmp.lt.u32.totalorder %s2101_s12, %s2650_s3 }
  0x11   : > { %p2103_p9 = pneg %p2334_p7 }
  0x13   : > { %p2104_p10 = pnand %p2103_p9, %p2102_p8 }
  0x15   : > { %p2105_p11 = pneg %p2104_p10 }
  0x17   : > { %p2110_p13 = pnand %p2108_p12, %p2105_p11 }
  0x19   : > { %2113 = shalt.err (!%p2110_p13)
}
  0x1a   : > { %s2114_s17 = scalar_lea.vmem %s315_s25, 512  ;;  %p2122_p6 = scmp.lt.s32.totalorder %s315_s25, %s315_s25 }
  0x1b   : > { %p2115_p0 = scmp.ne.s32.totalorder %s315_s25, %s2114_s17  ;;  %p2123_p1 = scmp.lt.s32.totalorder %s2114_s17, %s2114_s17 }
  0x1d   : > { %p2117_p2 = pnand %p2115_p0, %p2103_p9  ;;  %p2124_p4 = por %p2123_p1, %p2122_p6 }
  0x1f   : > { %p2118_p3 = pneg %p2117_p2 }
  0x21   : > { %p2125_p5 = pnand %p2124_p4, %p2118_p3 }
  0x23   : > { %2128 = shalt.err (!%p2125_p5)
}
  0x24   : > { %s2229_s24 = smov 128   ;;  %s2230_s27 = smov 8  }
  0x25   : > { %2049 = dma.hbm_to_vmem [thread:$0]  (!%p2334_p7), %s2650_s3, 512, %s315_s25, [#allocation5], %s2229_s24, %s2229_s24, %s2230_s27  }
  0x26   : > { %s2129_s14 = scalar_lea.hbm %s2654_s7, 2048 }
  0x27   : > { %p2130_p8 = scmp.ne.s32.totalorder %s2654_s7, %s2129_s14  ;;  %p2136_p5 = scmp.lt.u32.totalorder %s2129_s14, %s2654_s7 }
  0x29   : > { %p2132_p1 = pnand %p2130_p8, %p2103_p9 }
  0x2b   : > { %p2133_p4 = pneg %p2132_p1 }
  0x2d   : > { %p2138_p10 = pnand %p2136_p5, %p2133_p4 }
  0x2f   : > { %2141 = shalt.err (!%p2138_p10)
}
  0x30   : > { %s2142_s25 = scalar_lea.vmem %s2338_s28, 2048  ;;  %p2150_p0 = scmp.lt.s32.totalorder %s2338_s28, %s2338_s28 }
  0x31   : > { %p2143_p11 = scmp.ne.s32.totalorder %s2338_s28, %s2142_s25  ;;  %p2151_p2 = scmp.lt.s32.totalorder %s2142_s25, %s2142_s25 }
  0x33   : > { %p2145_p12 = pnand %p2143_p11, %p2103_p9  ;;  %p2152_p3 = por %p2151_p2, %p2150_p0 }
  0x35   : > { %p2146_p13 = pneg %p2145_p12 }
  0x37   : > { %p2153_p6 = pnand %p2152_p3, %p2146_p13 }
  0x39   : > { %2156 = shalt.err (!%p2153_p6)
}
  0x3a   : > { %2052 = dma.hbm_to_vmem [thread:$0]  (!%p2334_p7), %s2654_s7, 2048, %s2338_s28, [#allocation5], %s2229_s24, %s2229_s24, %s2230_s27  }
  0x3b   : > { %s2388_s30 = sadd.s32 1, %s2225_s20   ;;  %s84_s12 = sadd.s32 1, %s2221_s19 }
  0x3c   : > { %s81_s26 = ssub.s32 %s2225_s20, %s2388_s30  ;;  %p91_p9 = scmp.ne.s32.totalorder %s2221_s19, %s2217_s18 }
  0x3d   : > { %p82_p8 = scmp.eq.s32.totalorder %s81_s26, 0  ;;  %p92_p1 = scmp.eq.s32.totalorder %s2225_s20, 0 }
  0x3e   : > { %p2059_p4 = scmp.lt.s32.totalorder %s2225_s20, 4  ;;  %s373_s13 = sand.u32 1, %s2221_s19  }
  0x3f   : > { %s2399_s14 = scalar_select %p82_p8, %s2221_s19, %s84_s12  }
  0x40   : > { %p93_p5 = por %p92_p1, %p91_p9  ;;  %s1736_s15 = sshll.u32 %s373_s13, 3 }
  0x41   : > { %s1737_s16 = sshll.u32 %s2225_s20, 7  ;;  %s377_s28 = scalar_lea.vmem [#allocation2], %s1736_s15 }
  0x42   : > { %s2405_s11 = scalar_lea.hbm %s2649_s2, %s1737_s16  ;;  %s384_s24 = sshll.u32 %s377_s28, 4  ;;  %s2411_s24 = int_to_ptr.vmem [resolvable:$true] %s384_s24 }
  0x43   : > { %p2407_p7 = pnand %p2059_p4, %p93_p5  ;;  %s374_s20 = scalar_lea.sflag [#allocation3], %s373_s13 }
  0x44   : > { %s2157_s29 = scalar_lea.hbm %s2405_s11, 128  ;;  %s2162_s15 = scalar_lea.hbm %s2649_s2, 512 }
  0x45   : > { %p2158_p10 = scmp.ne.s32.totalorder %s2405_s11, %s2157_s29  ;;  %p2159_p11 = pneg %p2407_p7 }
  0x46   : > { %p2163_p0 = scmp.lt.u32.totalorder %s2405_s11, %s2649_s2  ;;  %p2164_p2 = scmp.lt.u32.totalorder %s2162_s15, %s2157_s29 }
  0x47   : > { %p2160_p12 = pnand %p2159_p11, %p2158_p10  ;;  %p2166_p6 = scmp.lt.u32.totalorder %s2157_s29, %s2405_s11 }
  0x48   : > { %p2165_p3 = por %p2164_p2, %p2163_p0 }
  0x49   : > { %p2161_p13 = pneg %p2160_p12 }
  0x4a   : > { %p2167_p9 = por %p2166_p6, %p2165_p3 }
  0x4c   : > { %p2168_p8 = pnand %p2167_p9, %p2161_p13 }
  0x4e   : > { %2171 = shalt.err (!%p2168_p8)
}
  0x4f   : > { %s2172_s13 = scalar_lea.vmem %s2411_s24, 128  ;;  %s2231_s25 = smov [#allocation2]  }
  0x50   : > { %p2173_p1 = scmp.ne.s32.totalorder %s2411_s24, %s2172_s13  ;;  %s2177_s28 = sshll.u32 %s2231_s25, 4  ;;  %s2178_s28 = int_to_ptr.vmem [resolvable:$false] %s2177_s28 }
  0x51   : > { %s2179_s12 = scalar_lea.vmem %s2178_s28, 256  ;;  %p2180_p10 = scmp.lt.s32.totalorder %s2411_s24, %s2178_s28 }
  0x52   : > { %p2175_p4 = pnand %p2173_p1, %p2159_p11  ;;  %p2181_p12 = scmp.lt.s32.totalorder %s2179_s12, %s2172_s13 }
  0x54   : > { %p2176_p5 = pneg %p2175_p4  ;;  %p2182_p0 = por %p2181_p12, %p2180_p10 }
  0x56   : > { %p2183_p2 = pnand %p2182_p0, %p2176_p5 }
  0x58   : > { %2186 = shalt.err (!%p2183_p2)
}
  0x59   : > { %2056 = dma.hbm_to_vmem [thread:$0]  (!%p2407_p7), %s2405_s11, 128, %s2411_s24, %s374_s20  }
  0x5a   : > { %p2667_p13 = scmp.ne.s32.totalorder %s2664_s23, 0 }
  0x5b   : > { %s395_s29 = sand.u32 (!%p2667_p13), 1, %s2217_s18   ;;  %p2668_p11 = scmp.ne.s32.totalorder (!%p2667_p13), %s2663_s22, 0 }
  0x5c   : > { %393 = sbr.rel (%p2667_p13) target bundleno = 3138 (0xc42), region = 64  ;;  %s2441_s26 = sshll.u32 (!%p2667_p13), %s395_s29, 3 }
  0x5d   : > { %s396_s15 = scalar_lea.sflag (!%p2667_p13), [#allocation3], %s395_s29  ;;  %s399_s16 = scalar_lea.vmem (!%p2667_p13), [#allocation2], %s2441_s26 }
  0x63   : > { %2204 = dma.done.wait (%p2668_p11), %s396_s15, 128  }
  0x64   : > { %2206 = vsyncadd (%p2668_p11), %s396_s15, 4294967168  ;;  %p2669_p3 = scmp.eq.s32.totalorder %s2314_s21, 0 }
  0x66   : > { %2208 = dma.done.wait (%p2669_p3), [#allocation5], 2560   ;;  %p2670_p7 = pmov %p2669_p3 }
  0x67   : > { %p453_p6 = scmp.lt.s32.totalorder %s2314_s21, 3  ;;  %v2232_v0 = vmov 0.0|0.0   ;;  %vm2233_vm0 = vmmov 0   ;;  %v2234_v1 = vmov 0.0   ;;  %v468_v2 = vld [vmem:[#allocation4] sm:$0xff]  ;;  %v469_v3 = vld [vmem:[#allocation4 + $0x8] sm:$0xff] }
  0x68   : > { %2210 = vsyncadd (%p2670_p7), [#allocation5], 4294964736  ;;  %1976 = vmatprep.subr.bf16.mxu0 %v2232_v0  ;;  %1854 = vmatprep.mubr.msk.f32.mxu0 %vm2233_vm0, %v2234_v1  ;;  %v470_v4 = vld [vmem:[#allocation4 + $0x10] sm:$0xff]  ;;  %v1977_v5 = vpack.c.bf16 %v469_v3, %v468_v2  ;;  %v471_v6 = vld [vmem:[#allocation4 + $0x18] sm:$0xff]  ;;  %vm479_vm1 = vcmask 261120   ;;  %vm637_vm2 = vcmask 64512  }
  0x69   : > { %1982 = vmatprep.subr.bf16.mxu1 %v2232_v0  ;;  %1865 = vmatprep.mubr.msk.f32.mxu1 %vm2233_vm0, %v2234_v1  ;;  %s2677_s21 = smov (!%p453_p6, %s2314_s21), 3  ;;  %v553_v7 = vld [vmem:[%s2652_s5] sm:$0xff]  ;;  %v554_v8 = vld [vmem:[%s2652_s5 + $0x8] sm:$0xff]  ;;  %v1980_v9 = vpack.c.bf16 %v471_v6, %v470_v4  ;;  %v555_v12 = vld [vmem:[%s2652_s5 + $0x10] sm:$0xff]  ;;  %s2671_s12 = sld [smem:[#allocation9_spill]] }
  0x6a   : > { %s2460_s22 = sshll.u32 %s2677_s21, 3  ;;  %1978 = vmatpush3.bf16.msra.mxu0 %v1977_v5  ;;  %v1983_v10 = vpack.c.bf16 %v554_v8, %v553_v7  ;;  %v556_v13 = vld [vmem:[%s2652_s5 + $0x18] sm:$0xff]  ;;  %v1745_v15 = vld [vmem:[%s2651_s4] ss:$0 sm:$0xff]  ;;  %v712_v19 = vld [vmem:[#allocation6] sm:$0xff] }
  0x6b   : > { %1979 = vmatprep.subr.bf16.mxu0 %v2232_v0  ;;  %s456_s13 = scalar_lea.vmem %s2647_s0, %s2460_s22  ;;  %v1986_v14 = vpack.c.bf16 %v556_v13, %v555_v12  ;;  %v713_v20 = vld [vmem:[#allocation6 + $0x8] sm:$0xff]  ;;  %v1747_v22 = vld [vmem:[%s2653_s6] ss:$0 sm:$0xff]  ;;  %s460_s20 = scalar_lea.vmem %s2648_s1, %s2460_s22  ;;  %v715_v28 = vld [vmem:[#allocation6 + $0x18] sm:$0xff] }
  0x6c   : > { %1984 = vmatpush3.bf16.msra.mxu1 %v1983_v10  ;;  %v465_v11 = vld [vmem:[%s456_s13] sm:$0xff]  ;;  %v1989_v21 = vpack.c.bf16 %v713_v20, %v712_v19  ;;  %v1753_v31 = vld [vmem:[%s2652_s5 + $0x28] sm:$0xff]  ;;  %v1754_v36 = vld [vmem:[%s2652_s5 + $0x30] sm:$0xff] }
  0x6d   : > { %1985 = vmatprep.subr.bf16.mxu1 %v2232_v0  ;;  %v2499_v26 = vld [vmem:[%s460_s20] sm:$0xff]  ;;  %v1755_v37 = vld [vmem:[%s2652_s5 + $0x38] sm:$0xff]  ;;  %v958_v44 = vld [vmem:[#allocation6 + $0x20] sm:$0xff] }
  0x6e   : > { %1981 = vmatpush3.bf16.msra.mxu0 %v1980_v9  ;;  %v714_v27 = vld [vmem:[#allocation6 + $0x10] sm:$0xff]  ;;  %v1998_v38 = vpack.c.bf16 %v1755_v37, %v1754_v36  ;;  %v959_v45 = vld [vmem:[#allocation6 + $0x28] sm:$0xff]  ;;  %v961_v53 = vld [vmem:[#allocation6 + $0x38] sm:$0xff] }
  0x6f   : > { %1868 = vmatprep.subr.mxu0 %v2234_v1  ;;  %v1992_v29 = vpack.c.bf16 %v715_v28, %v714_v27  ;;  %v1752_v30 = vld [vmem:[%s2652_s5 + $0x20] sm:$0xff]  ;;  %v2001_v46 = vpack.c.bf16 %v959_v45, %v958_v44  ;;  %v1764_v56 = vld [vmem:[%s2652_s5 + $0x48] sm:$0xff]  ;;  %v1765_v61 = vld [vmem:[%s2652_s5 + $0x50] sm:$0xff]  ;;  %s464_s29 = scalar_lea.vmem %s2671_s12, %s2460_s22 }
  0x70   : > { %1987 = vmatpush3.bf16.msra.mxu1 %v1986_v14  ;;  %v1995_v32 = vpack.c.bf16 %v1753_v31, %v1752_v30  ;;  %v1750_v39 = vld [vmem:[%s2655_s8] ss:$0 sm:$0xff]  ;;  %v1757_v47 = vld [vmem:[%s2653_s6 + $0x1] ss:$0 sm:$0xff]  ;;  %v1766_v62 = vld [vmem:[%s2652_s5 + $0x58] sm:$0xff] }
  0x71   : > { %1855 = vmatmul.mubr.msk.f32.vlgmr.msra.gmra.mrb[0].mxu0 %vm479_vm1, %v465_v11  ;;  %1988 = vmatprep.subr.bf16.mxu1 %v2232_v0  ;;  %v2536_v51 = vld [vmem:[%s399_s16] sm:$0xff]  ;;  %v2010_v63 = vpack.c.bf16 %v1766_v62, %v1765_v61  ;;  %v1202_v7 = vld [vmem:[#allocation6 + $0x40] sm:$0xff]  ;;  %v1203_v8 = vld [vmem:[#allocation6 + $0x48] sm:$0xff] }
  0x72   : > { %1870 = vmatprep.mubr.msk.f32.mxu0 %vm2233_vm0, %v2234_v1  ;;  %v960_v52 = vld [vmem:[#allocation6 + $0x30] sm:$0xff]  ;;  %v2013_v9 = vpack.c.bf16 %v1203_v8, %v1202_v7  ;;  %v1446_v31 = vld [vmem:[#allocation6 + $0x60] sm:$0xff] }
  0x73   : > { %v2004_v54 = vpack.c.bf16 %v961_v53, %v960_v52  ;;  %v1763_v55 = vld [vmem:[%s2652_s5 + $0x40] sm:$0xff] }
  0x74   : > { %v2007_v57 = vpack.c.bf16 %v1764_v56, %v1763_v55  ;;  %v1761_v2 = vld [vmem:[%s2655_s8 + $0x1] ss:$0 sm:$0xff]  ;;  %v1768_v10 = vld [vmem:[%s2653_s6 + $0x2] ss:$0 sm:$0xff] }
  0x75   : > { %v1204_v14 = vld [vmem:[#allocation6 + $0x50] sm:$0xff] }
 0x144   : > { %v549_v16 = vpop.f32.mrb[0].mxu0 }
 0x145   : > { %v550_v17 = vadd.f32 %v1745_v15, %v549_v16  ;;  %v1856_v18 = vpop.f32.mrb[1].mxu0  ;;  %v1205_v15 = vld [vmem:[#allocation6 + $0x58] sm:$0xff] }
 0x146   : > { %v2016_v16 = vpack.c.bf16 %v1205_v15, %v1204_v14  ;;  %v1775_v18 = vld [vmem:[%s2652_s5 + $0x68] sm:$0xff] }
 0x147   : > { %1866 = vmatmul.mubr.msk.f32.vlgmr.msra.gmra.mrb[0].mxu1 %vm479_vm1, %v550_v17  ;;  %v1774_v17 = vld [vmem:[%s2652_s5 + $0x60] sm:$0xff] }
 0x148   : > { %1881 = vmatprep.mubr.msk.f32.mxu1 %vm2233_vm0, %v2234_v1  ;;  %1990 = vmatpush3.bf16.msra.mxu1 %v1989_v21  ;;  %v2019_v19 = vpack.c.bf16 %v1775_v18, %v1774_v17 }
 0x149   : > { %1991 = vmatprep.subr.bf16.mxu1 %v2232_v0 }
 0x14c   : > { %1993 = vmatpush3.bf16.msra.mxu1 %v1992_v29 }
 0x14d   : > { %1895 = vmatprep.subr.mxu1 %v2234_v1 }
 0x21a   : > { %v633_v23 = vpop.f32.mrb[0].mxu1 }
 0x21b   : > { %v634_v24 = vadd.f32 %v1747_v22, %v633_v23  ;;  %v1867_v25 = vpop.f32.mrb[1].mxu1  ;;  %v1776_v23 = vld [vmem:[%s2652_s5 + $0x70] sm:$0xff] }
 0x21d   : > { %1869 = vmatpush3.msra.mxu0 %v634_v24  ;;  %v1777_v24 = vld [vmem:[%s2652_s5 + $0x78] sm:$0xff] }
 0x21e   : > { %1871 = vmatmul.mubr.msk.f32.vlgmr.msra.gmra.mrb[2].mxu0 %vm637_vm2, %v2499_v26  ;;  %1994 = vmatprep.subr.bf16.mxu0 %v2232_v0  ;;  %v2022_v25 = vpack.c.bf16 %v1777_v24, %v1776_v23 }
 0x21f   : > { %1892 = vmatprep.mubr.msk.f32.mxu0 %vm2233_vm0, %v2234_v1  ;;  %1996 = vmatpush3.bf16.msra.mxu0 %v1995_v32  ;;  %v1447_v32 = vld [vmem:[#allocation6 + $0x68] sm:$0xff] }
 0x220   : > { %1997 = vmatprep.subr.bf16.mxu0 %v2232_v0 }
 0x223   : > { %1999 = vmatpush3.bf16.msra.mxu0 %v1998_v38  ;;  %v1448_v38 = vld [vmem:[#allocation6 + $0x70] sm:$0xff] }
 0x224   : > { %2000 = vmatprep.subr.bf16.mxu0 %v2232_v0 }
 0x2f1   : > { %v707_v33 = vpop.f32.mrb[2].mxu0 }
 0x2f2   : > { %v711_v34 = vmax.f32 %v707_v33, 0.0  ;;  %v1872_v35 = vpop.f32.mrb[3].mxu0  ;;  %v2025_v33 = vpack.c.bf16 %v1447_v32, %v1446_v31 }
 0x2f4   : > { %1882 = vmatmul.mubr.msk.f32.vlgmr.msra.gmra.mrb[2].mxu1 %vm479_vm1, %v711_v34  ;;  %v1779_v34 = vld [vmem:[%s2653_s6 + $0x3] ss:$0 sm:$0xff] }
 0x2f5   : > { %1897 = vmatprep.mubr.msk.f32.mxu1 %vm2233_vm0, %v2234_v1 }
 0x3c7   : > { %v792_v40 = vpop.f32.mrb[2].mxu1 }
 0x3c8   : > { %v793_v41 = vadd.f32 %v1750_v39, %v792_v40  ;;  %v1883_v42 = vpop.f32.mrb[3].mxu1  ;;  %v1449_v39 = vld [vmem:[#allocation6 + $0x78] sm:$0xff] }
 0x3c9   : > { %v2028_v40 = vpack.c.bf16 %v1449_v39, %v1448_v38  ;;  %v1533_v42 = vld [vmem:[%s2656_s9 + $0x8] sm:$0xff] }
 0x3ca   : > { %v796_v43 = vmax.f32 %v793_v41, 0.0  ;;  %v1532_v41 = vld [vmem:[%s2656_s9] sm:$0xff] }
 0x3cc   : > { %1893 = vmatmul.mubr.msk.f32.vlgmr.msra.gmra.mrb[4].mxu0 %vm479_vm1, %v796_v43  ;;  %v2031_v43 = vpack.c.bf16 %v1533_v42, %v1532_v41 }
 0x3cd   : > { %1908 = vmatprep.mubr.msk.f32.mxu0 %vm2233_vm0, %v2234_v1  ;;  %2002 = vmatpush3.bf16.msra.mxu0 %v2001_v46 }
 0x3ce   : > { %2003 = vmatprep.subr.bf16.mxu0 %v2232_v0 }
 0x3d1   : > { %2005 = vmatpush3.bf16.msra.mxu0 %v2004_v54 }
 0x3d2   : > { %1922 = vmatprep.subr.mxu0 %v2234_v1 }
 0x49f   : > { %v879_v48 = vpop.f32.mrb[4].mxu0 }
 0x4a0   : > { %v880_v49 = vadd.f32 %v1757_v47, %v879_v48  ;;  %v1894_v50 = vpop.f32.mrb[5].mxu0  ;;  %v1535_v47 = vld [vmem:[%s2656_s9 + $0x18] sm:$0xff] }
 0x4a2   : > { %1896 = vmatpush3.msra.mxu1 %v880_v49  ;;  %v1783_v49 = vld [vmem:[%s2655_s8 + $0x3] ss:$0 sm:$0xff] }
 0x4a3   : > { %1898 = vmatmul.mubr.msk.f32.vlgmr.msra.gmra.mrb[4].mxu1 %vm637_vm2, %v2536_v51  ;;  %2006 = vmatprep.subr.bf16.mxu1 %v2232_v0 }
 0x4a4   : > { %1919 = vmatprep.mubr.msk.f32.mxu1 %vm2233_vm0, %v2234_v1  ;;  %2008 = vmatpush3.bf16.msra.mxu1 %v2007_v57 }
 0x4a5   : > { %2009 = vmatprep.subr.bf16.mxu1 %v2232_v0 }
 0x4a8   : > { %2011 = vmatpush3.bf16.msra.mxu1 %v2010_v63  ;;  %v1616_v63 = vld [vmem:[%s2657_s10] sm:$0x1] }
 0x4a9   : > { %2012 = vmatprep.subr.bf16.mxu1 %v2232_v0 }
 0x576   : > { %v952_v58 = vpop.f32.mrb[4].mxu1 }
 0x577   : > { %v956_v59 = vmax.f32 %v952_v58, 0.0  ;;  %v1899_v60 = vpop.f32.mrb[5].mxu1  ;;  %v1618_v58 = vlaneseq }
 0x579   : > { %1909 = vmatmul.mubr.msk.f32.vlgmr.msra.gmra.mrb[6].mxu0 %vm479_vm1, %v956_v59  ;;  %v1619_v61 = vshrl.u32 %v1618_v58, 7 }
 0x57a   : > { %1924 = vmatprep.mubr.msk.f32.mxu0 %vm2233_vm0, %v2234_v1 }
 0x64c   : > { %v1039_v3 = vpop.f32.mrb[6].mxu0 }
 0x64d   : > { %v1040_v4 = vadd.f32 %v1761_v2, %v1039_v3  ;;  %v1910_v5 = vpop.f32.mrb[7].mxu0  ;;  %v1620_v3 = vsub.s32 0, %v1619_v61 }
 0x64f   : > { %v1043_v6 = vmax.f32 %v1040_v4, 0.0 }
 0x651   : > { %1920 = vmatmul.mubr.msk.f32.vlgmr.msra.gmra.mrb[6].mxu1 %vm479_vm1, %v1043_v6 }
 0x652   : > { %1935 = vmatprep.mubr.msk.f32.mxu1 %vm2233_vm0, %v2234_v1  ;;  %2014 = vmatpush3.bf16.msra.mxu1 %v2013_v9 }
 0x653   : > { %2015 = vmatprep.subr.bf16.mxu1 %v2232_v0 }
 0x656   : > { %2017 = vmatpush3.bf16.msra.mxu1 %v2016_v16 }
 0x657   : > { %1949 = vmatprep.subr.mxu1 %v2234_v1 }
 0x724   : > { %v1126_v11 = vpop.f32.mrb[6].mxu1 }
 0x725   : > { %v1127_v12 = vadd.f32 %v1768_v10, %v1126_v11  ;;  %v1921_v13 = vpop.f32.mrb[7].mxu1 }
 0x727   : > { %1923 = vmatpush3.msra.mxu0 %v1127_v12 }
 0x728   : > { %1925 = vmatmul.mubr.msk.f32.vlgmr.msra.gmra.mrb[8].mxu0 %vm637_vm2, %v2499_v26  ;;  %2018 = vmatprep.subr.bf16.mxu0 %v2232_v0  ;;  %v1772_v26 = vld [vmem:[%s2655_s8 + $0x2] ss:$0 sm:$0xff] }
 0x729   : > { %1946 = vmatprep.mubr.msk.f32.mxu0 %vm2233_vm0, %v2234_v1  ;;  %2020 = vmatpush3.bf16.msra.mxu0 %v2019_v19 }
 0x72a   : > { %2021 = vmatprep.subr.bf16.mxu0 %v2232_v0 }
 0x72d   : > { %2023 = vmatpush3.bf16.msra.mxu0 %v2022_v25 }
 0x72e   : > { %2024 = vmatprep.subr.bf16.mxu0 %v2232_v0 }
 0x7fb   : > { %v1196_v20 = vpop.f32.mrb[8].mxu0 }
 0x7fc   : > { %v1200_v21 = vmax.f32 %v1196_v20, 0.0  ;;  %v1926_v22 = vpop.f32.mrb[9].mxu0 }
 0x7fe   : > { %1936 = vmatmul.mubr.msk.f32.vlgmr.msra.gmra.mrb[8].mxu1 %vm479_vm1, %v1200_v21 }
 0x7ff   : > { %1951 = vmatprep.mubr.msk.f32.mxu1 %vm2233_vm0, %v2234_v1 }
 0x8d1   : > { %v1283_v27 = vpop.f32.mrb[8].mxu1 }
 0x8d2   : > { %v1284_v28 = vadd.f32 %v1772_v26, %v1283_v27  ;;  %v1937_v29 = vpop.f32.mrb[9].mxu1 }
 0x8d4   : > { %v1287_v30 = vmax.f32 %v1284_v28, 0.0 }
 0x8d6   : > { %1947 = vmatmul.mubr.msk.f32.vlgmr.msra.gmra.mrb[10].mxu0 %vm479_vm1, %v1287_v30 }
 0x8d7   : > { %1962 = vmatprep.mubr.msk.f32.mxu0 %vm2233_vm0, %v2234_v1  ;;  %2026 = vmatpush3.bf16.msra.mxu0 %v2025_v33 }
 0x8d8   : > { %2027 = vmatprep.subr.bf16.mxu0 %v2232_v0 }
 0x8db   : > { %2029 = vmatpush3.bf16.msra.mxu0 %v2028_v40 }
 0x9a9   : > { %v1370_v35 = vpop.f32.mrb[10].mxu0 }
 0x9aa   : > { %v1371_v36 = vadd.f32 %v1779_v34, %v1370_v35  ;;  %v1948_v37 = vpop.f32.mrb[11].mxu0 }
 0x9ac   : > { %1950 = vmatpush3.msra.mxu1 %v1371_v36 }
 0x9ad   : > { %1952 = vmatmul.mubr.msk.f32.vlgmr.msra.gmra.mrb[10].mxu1 %vm637_vm2, %v2536_v51  ;;  %2030 = vmatprep.subr.bf16.mxu1 %v2232_v0 }
 0x9ae   : > { %1973 = vmatprep.mubr.msk.f32.mxu1 %vm2233_vm0, %v2234_v1  ;;  %2032 = vmatpush3.bf16.msra.mxu1 %v2031_v43  ;;  %v1534_v1 = vld [vmem:[%s2656_s9 + $0x10] sm:$0xff] }
 0x9af   : > { %2033 = vmatprep.subr.bf16.mxu1 %v2232_v0  ;;  %v2034_v48 = vpack.c.bf16 %v1535_v47, %v1534_v1 }
 0x9b2   : > { %2035 = vmatpush3.bf16.msra.mxu1 %v2034_v48 }
 0xa80   : > { %v1440_v44 = vpop.f32.mrb[10].mxu1 }
 0xa81   : > { %v1444_v45 = vmax.f32 %v1440_v44, 0.0  ;;  %v1953_v46 = vpop.f32.mrb[11].mxu1 }
 0xa83   : > { %1963 = vmatmul.mubr.msk.f32.vlgmr.msra.gmra.mrb[12].mxu0 %vm479_vm1, %v1444_v45 }
 0xb56   : > { %v1527_v0 = vpop.f32.mrb[12].mxu0 }
 0xb57   : > { %v1528_v50 = vadd.f32 %v1783_v49, %v1527_v0  ;;  %v1964_v51 = vpop.f32.mrb[13].mxu0 }
 0xb59   : > { %v1531_v52 = vmax.f32 %v1528_v50, 0.0 }
 0xb5b   : > { %1974 = vmatmul.mubr.msk.f32.vlgmr.msra.gmra.mrb[12].mxu1 %vm479_vm1, %v1531_v52 }
 0xc2e   : > { %v1605_v53 = vpop.f32.mrb[12].mxu1 }
 0xc2f   : > { %v1609_v54 = vrot.slane %v1605_v53, 4  ;;  %v1975_v55 = vpop.f32.mrb[13].mxu1 }
 0xc31   : > { %v1610_v56 = vadd.f32 %v1609_v54, %v1605_v53 }
 0xc33   : > { %v1611_v57 = vrot.slane %v1610_v56, 2 }
 0xc35   : > { %v1612_v59 = vadd.f32 %v1611_v57, %v1610_v56 }
 0xc37   : > { %v1613_v60 = vrot.slane %v1612_v59, 1 }
 0xc39   : > { %v1614_v62 = vadd.f32 %v1613_v60, %v1612_v59 }
 0xc3b   : > { %v1615_v2 = vmul.f32 0.125, %v1614_v62 }
 0xc3d   : > { %v1617_v4 = vadd.f32 %v1616_v63, %v1615_v2 }
 0xc3f   : > { %v1621_v5 = vrot.slane %v1617_v4, %v1620_v3 }
 0xc41   : > { %1622 = vst [vmem:[%s464_s29] sm:$0xff] %v1621_v5 }
 0xc42 PF: > { %p22_p9 = scmp.ge.s32.totalorder %s2388_s30, 6   ;;  %s2672_s17 = smov %s2217_s18 }
 0xc43   : > { %s2673_s18 = smov %s2221_s19  ;;  %s2674_s19 = smov %s2399_s14 }
 0xc44   : > { %s2675_s20 = smov %s2388_s30  ;;  %24 = sbr.rel (!%p22_p9) target bundleno = 6 (0x6), region = 130 }
 0xc4b   :  { %1642 = vsyncpa [#allocation3], 1 }
 0xc4c   :  { %1644 = vsyncpa [#allocation3 + $0x1], 1 }
 0xc4d   :  { %1645 = vsyncpa [#allocation5], 1 }

</bundles_post_ra>
